<compile_context>
chip_gen: v6e
topology: v6e:2x2x1
jax: 0.10.0
libtpu: 0.0.40
codegen_flags: <defaults>
</compile_context>

<pallas_src>
import jax
import jax.numpy as jnp
from jax.experimental import pallas as pl
from jax.experimental.pallas import tpu as pltpu


def _timesfm_last_step_kernel(xw_ref, w1_ref, b1_ref, w2_ref, b2_ref, wh_ref,
                              out_ref):
    # xw_ref : (bb, 4*C)   last 3 real timesteps + one zero pad row, flattened
    #                      (mm_dtype)
    # w1_ref : (4*C, 2*D)  block-structured fused conv1 weight: columns 0:D
    #                      produce h1[T-2] (taps on lanes 0:3C), columns D:2D
    #                      produce h1[T-1] (taps on lanes C:4C)       (mm_dtype)
    # b1_ref : (1, 2*D)    conv1 bias tiled twice                     (float32)
    # w2_ref : (2*D, D)    conv2 taps 0,1 stacked; tap 2 sees only the zero pad
    #                                                                 (mm_dtype)
    # b2_ref : (1, D)      float32
    # wh_ref : (1, D)      head weight as a row vector, float32
    # out_ref: (1, bb)     lane-dense output row, float32

    # conv1 at t=T-2 and t=T-1 in ONE MXU matmul (f32 accumulation); the ReLU
    # result is already the conv2 im2col row [h1[T-2] | h1[T-1]].
    h1 = jnp.dot(xw_ref[...], w1_ref[...], preferred_element_type=jnp.float32)
    h1 = jnp.maximum(h1 + b1_ref[...], 0.0)                     # (bb, 2D)

    # conv2 at t=T-1 only (tap 2 pairs with the zero pad row -> dropped).
    h2 = jnp.dot(h1.astype(w2_ref.dtype), w2_ref[...],
                 preferred_element_type=jnp.float32)
    h2 = jnp.maximum(h2 + b2_ref[...], 0.0)                     # (bb, D)

    # TODO(synk): TimesFM core treated as identity (opaque pretrained model).
    # Head Linear(D, 1): VPU multiply + lane reduce; store lane-dense (1, bb).
    out = jnp.sum(h2 * wh_ref[...], axis=-1)                    # (bb,)
    out_ref[...] = out.reshape(1, -1).astype(out_ref.dtype)


def _batch_tiling(batch, cap):
    """Returns (batch_tile, padded_batch).  One fat grid step when possible."""
    cap = max(128, (cap // 128) * 128)         # keep multi-step tiles 128-aligned
    if batch <= cap:
        bb = pl.cdiv(batch, 8) * 8             # single step; 8-aligned sublanes
        return bb, bb
    bb = cap                                   # multiple of 128 -> lane-dense out
    return bb, pl.cdiv(batch, bb) * bb


def timesfm_wrapper_forward(x, params, *, mm_dtype=jnp.bfloat16,
                            batch_tile_cap=1024):
    """x: (B, T, C) float32 -> (B,) float32 next-step prediction.

    mm_dtype is the MXU operand dtype (x tile + conv weights); bf16 is the
    default on all generations (v5e's MXU is natively bf16 as well).
    Accumulation, biases, ReLU and the head stay float32.  Pass jnp.float32
    for bit-tighter results.
    """
    B, T, C = x.shape
    assert T >= 2, "need at least 2 timesteps"
    D = params['w1'].shape[-1]

    # ---- wrapper-side preprocessing (plain XLA, outside the kernel) --------
    # 'same' conv padding + last-step trimming: with an identity core and a
    # head reading only y_hat[:, -1, :], only the last 3 real timesteps plus
    # one zero row are ever needed -> O(1)-in-T HBM traffic and MXU work.
    x_pad = jnp.pad(x.astype(jnp.float32), ((0, 0), (1, 1), (0, 0)))
    x_tail = x_pad[:, -4:, :].reshape(B, 4 * C)                 # (B, 4C)

    # Fused conv1 weight (4C, 2D): columns 0:D = conv1 output at t=T-2
    # (window = lanes 0:3C); columns D:2D = conv1 at t=T-1 (window = lanes C:4C).
    w1 = params['w1'].reshape(3 * C, D)
    w1f = jnp.zeros((4 * C, 2 * D), jnp.float32)
    w1f = w1f.at[:3 * C, :D].set(w1)
    w1f = w1f.at[C:, D:].set(w1)
    b1f = jnp.concatenate([params['b1'], params['b1']], axis=-1)   # (1, 2D)
    w2s = params['w2'][:2].reshape(2 * D, D)                       # (2D, D)
    wh = params['wh'].reshape(1, D)

    # Cast the MXU operands ONCE here (not per grid step inside the kernel).
    x_tail = x_tail.astype(mm_dtype)
    w1f = w1f.astype(mm_dtype)
    w2s = w2s.astype(mm_dtype)

    bb, b_pad = _batch_tiling(B, batch_tile_cap)
    if b_pad != B:
        x_tail = jnp.pad(x_tail, ((0, b_pad - B), (0, 0)))
    steps = b_pad // bb

    const_idx = lambda i: (0, 0)

    def const_spec(shape):
        # Constant blocks never change across the grid -> single-buffer them.
        return pl.BlockSpec(shape, const_idx, pipeline_mode=pl.Buffered(1))

    if steps >= 4:
        # Deep-buffer the tiny x tiles only when the grid is long enough for
        # the extra prefetch depth to matter (costs almost no VMEM).
        x_spec = pl.BlockSpec((bb, 4 * C), lambda i: (i, 0),
                              pipeline_mode=pl.Buffered(3))
    else:
        x_spec = pl.BlockSpec((bb, 4 * C), lambda i: (i, 0))

    out = pl.pallas_call(
        _timesfm_last_step_kernel,
        out_shape=jax.ShapeDtypeStruct((1, b_pad), jnp.float32),
        grid=(steps,),
        in_specs=[
            x_spec,                          # x tile, streamed over the grid
            const_spec((4 * C, 2 * D)),      # fused conv1 weight (resident)
            const_spec((1, 2 * D)),          # fused conv1 bias
            const_spec((2 * D, D)),          # conv2 taps 0,1
            const_spec((1, D)),              # conv2 bias
            const_spec((1, D)),              # head weight row
        ],
        out_specs=pl.BlockSpec((1, bb), lambda i: (0, i)),      # lane-dense
        compiler_params=pltpu.CompilerParams(
            dimension_semantics=("parallel",)),
    )(x_tail, w1f, b1f, w2s, params['b2'], wh)

    # Head bias folded here (removes a (1,1) VMEM block and a per-step DMA).
    return out[0, :B] + params['bh'][0, 0]


def init_params(key, n_channels, d_model):
    ks = jax.random.split(key, 6)
    s = 0.1
    return {
        # conv1: torch weight (D, C, 3) stored as (3, C, D); tap k pairs with x[t+k-1]
        'w1': s * jax.random.normal(ks[0], (3, n_channels, d_model), jnp.float32),
        'b1': s * jax.random.normal(ks[1], (1, d_model), jnp.float32),
        # conv2: torch weight (D, D, 3) stored as (3, D, D)
        'w2': s * jax.random.normal(ks[2], (3, d_model, d_model), jnp.float32),
        'b2': s * jax.random.normal(ks[3], (1, d_model), jnp.float32),
        # head: torch Linear(D, 1) weight (1, D) kept as a row vector
        'wh': s * jax.random.normal(ks[4], (1, d_model), jnp.float32),
        'bh': s * jax.random.normal(ks[5], (1, 1), jnp.float32),
    }


def reference_forward(x, p):
    """Pure-JAX reference of the PyTorch module semantics (full-length convs,
    identity TimesFM core, zero-init LoRA)."""
    def conv3_relu(h, w, b):
        hp = jnp.pad(h, ((0, 0), (1, 1), (0, 0)))
        out = (jnp.einsum('btc,cd->btd', hp[:, :-2], w[0])
               + jnp.einsum('btc,cd->btd', hp[:, 1:-1], w[1])
               + jnp.einsum('btc,cd->btd', hp[:, 2:], w[2])) + b[None]
        return jnp.maximum(out, 0.0)

    h = conv3_relu(conv3_relu(x, p['w1'], p['b1']), p['w2'], p['b2'])
    return jnp.sum(h[:, -1, :] * p['wh'], axis=-1) + p['bh'][0, 0]


if __name__ == "__main__":
    B, T, C, D = 2, 16, 4, 32   # batch=2, seq=16, channels=4, d_model=32

    key = jax.random.PRNGKey(0)
    kx, kp = jax.random.split(key)
    x = jax.random.normal(kx, (B, T, C), jnp.float32)
    params = init_params(kp, C, D)

    ref = reference_forward(x, params)

    # f32 MXU operands: tight check of the fused weights / last-step trimming.
    out_f32 = jax.block_until_ready(
        timesfm_wrapper_forward(x, params, mm_dtype=jnp.float32))
    assert out_f32.shape == (B,)
    assert jnp.allclose(out_f32, ref, atol=2e-3, rtol=2e-3), (out_f32, ref)

    # Default path: bf16 MXU operands with f32 accumulation (looser tolerance).
    out_bf16 = jax.block_until_ready(timesfm_wrapper_forward(x, params))
    assert out_bf16.shape == (B,)
    assert jnp.allclose(out_bf16, ref, atol=2e-2, rtol=2e-2), (out_bf16, ref)

    print("KERNEL_OK")
</pallas_src>

<mosaic_0001>
module attributes {stable_mosaic.version = 11 : i64} {
  func.func @_timesfm_last_step_kernel(%arg0: i32, %arg1: memref<8x16xf32, #tpu.memory_space<vmem>>, %arg2: memref<16x64xf32, #tpu.memory_space<vmem>>, %arg3: memref<1x64xf32, #tpu.memory_space<vmem>>, %arg4: memref<64x32xf32, #tpu.memory_space<vmem>>, %arg5: memref<1x32xf32, #tpu.memory_space<vmem>>, %arg6: memref<1x32xf32, #tpu.memory_space<vmem>>, %arg7: memref<1x8xf32, #tpu.memory_space<vmem>>) attributes {dimension_semantics = [#tpu.dimension_semantics<parallel>], iteration_bounds = array<i64: 1>, scalar_prefetch = 0 : i64, scratch_operands = 0 : i64, tpu.core_type = #tpu.core_type<tc>, window_params = [{transform_indices = @transform_0, window_bounds = array<i64: 8, 16>}, {pipeline_mode = #tpu.pipeline_mode<synchronous>, transform_indices = @transform_1, window_bounds = array<i64: 16, 64>}, {pipeline_mode = #tpu.pipeline_mode<synchronous>, transform_indices = @transform_2, window_bounds = array<i64: 1, 64>}, {pipeline_mode = #tpu.pipeline_mode<synchronous>, transform_indices = @transform_3, window_bounds = array<i64: 64, 32>}, {pipeline_mode = #tpu.pipeline_mode<synchronous>, transform_indices = @transform_4, window_bounds = array<i64: 1, 32>}, {pipeline_mode = #tpu.pipeline_mode<synchronous>, transform_indices = @transform_5, window_bounds = array<i64: 1, 32>}, {transform_indices = @transform_6, window_bounds = array<i64: 1, 8>}]} {
    %c0 = arith.constant 0 : index
    %c0_0 = arith.constant 0 : index
    %0 = vector.load %arg1[%c0, %c0_0] : memref<8x16xf32, #tpu.memory_space<vmem>>, vector<8x16xf32>
    %c0_1 = arith.constant 0 : index
    %c0_2 = arith.constant 0 : index
    %1 = vector.load %arg2[%c0_1, %c0_2] : memref<16x64xf32, #tpu.memory_space<vmem>>, vector<16x64xf32>
    %cst = arith.constant dense<0.000000e+00> : vector<8x64xf32>
    %2 = tpu.matmul %0, %1, %cst {dimension_numbers = #tpu.dot_dimension_numbers<[1], [0], [0], [1], [0, 0, 1, 1], [], []>} : vector<8x16xf32>, vector<16x64xf32>, vector<8x64xf32> -> vector<8x64xf32>
    %c0_3 = arith.constant 0 : index
    %c0_4 = arith.constant 0 : index
    %3 = vector.load %arg3[%c0_3, %c0_4] : memref<1x64xf32, #tpu.memory_space<vmem>>, vector<1x64xf32>
    %4 = vector.broadcast %3 : vector<1x64xf32> to vector<8x64xf32>
    %5 = arith.addf %2, %4 : vector<8x64xf32>
    %cst_5 = arith.constant 0.000000e+00 : f32
    %6 = vector.broadcast %cst_5 : f32 to vector<8x64xf32>
    %7 = arith.maximumf %5, %6 : vector<8x64xf32>
    %c0_6 = arith.constant 0 : index
    %c0_7 = arith.constant 0 : index
    %8 = vector.load %arg4[%c0_6, %c0_7] : memref<64x32xf32, #tpu.memory_space<vmem>>, vector<64x32xf32>
    %cst_8 = arith.constant dense<0.000000e+00> : vector<8x32xf32>
    %9 = tpu.matmul %7, %8, %cst_8 {dimension_numbers = #tpu.dot_dimension_numbers<[1], [0], [0], [1], [0, 0, 1, 1], [], []>} : vector<8x64xf32>, vector<64x32xf32>, vector<8x32xf32> -> vector<8x32xf32>
    %c0_9 = arith.constant 0 : index
    %c0_10 = arith.constant 0 : index
    %10 = vector.load %arg5[%c0_9, %c0_10] : memref<1x32xf32, #tpu.memory_space<vmem>>, vector<1x32xf32>
    %11 = vector.broadcast %10 : vector<1x32xf32> to vector<8x32xf32>
    %12 = arith.addf %9, %11 : vector<8x32xf32>
    %cst_11 = arith.constant 0.000000e+00 : f32
    %13 = vector.broadcast %cst_11 : f32 to vector<8x32xf32>
    %14 = arith.maximumf %12, %13 : vector<8x32xf32>
    %c0_12 = arith.constant 0 : index
    %c0_13 = arith.constant 0 : index
    %15 = vector.load %arg6[%c0_12, %c0_13] : memref<1x32xf32, #tpu.memory_space<vmem>>, vector<1x32xf32>
    %16 = vector.broadcast %15 : vector<1x32xf32> to vector<8x32xf32>
    %17 = arith.mulf %14, %16 : vector<8x32xf32>
    %cst_14 = arith.constant dense<0.000000e+00> : vector<8xf32>
    %18 = vector.multi_reduction <add>, %17, %cst_14 [1] : vector<8x32xf32> to vector<8xf32>
    %19 = vector.shape_cast %18 : vector<8xf32> to vector<1x8xf32>
    %c0_15 = arith.constant 0 : index
    %c0_16 = arith.constant 0 : index
    %20 = vector.load %arg7[%c0_15, %c0_16] : memref<1x8xf32, #tpu.memory_space<vmem>>, vector<1x8xf32>
    tpu.vector_store %arg7[%c0_15, %c0_16], %19 {strides = array<i32>} : memref<1x8xf32, #tpu.memory_space<vmem>>, vector<1x8xf32>,
    return
  }
  func.func @transform_0(%arg0: i32) -> (i32, i32) {
    %c0_i32 = arith.constant 0 : i32
    %c0_i32_0 = arith.constant 0 : i32
    return %arg0, %c0_i32 : i32, i32
  }
  func.func @transform_1(%arg0: i32) -> (i32, i32) {
    %c0_i32 = arith.constant 0 : i32
    %c0_i32_0 = arith.constant 0 : i32
    %c0_i32_1 = arith.constant 0 : i32
    return %c0_i32, %c0_i32_0 : i32, i32
  }
  func.func @transform_2(%arg0: i32) -> (i32, i32) {
    %c0_i32 = arith.constant 0 : i32
    %c0_i32_0 = arith.constant 0 : i32
    %c0_i32_1 = arith.constant 0 : i32
    return %c0_i32, %c0_i32_0 : i32, i32
  }
  func.func @transform_3(%arg0: i32) -> (i32, i32) {
    %c0_i32 = arith.constant 0 : i32
    %c0_i32_0 = arith.constant 0 : i32
    %c0_i32_1 = arith.constant 0 : i32
    return %c0_i32, %c0_i32_0 : i32, i32
  }
  func.func @transform_4(%arg0: i32) -> (i32, i32) {
    %c0_i32 = arith.constant 0 : i32
    %c0_i32_0 = arith.constant 0 : i32
    %c0_i32_1 = arith.constant 0 : i32
    return %c0_i32, %c0_i32_0 : i32, i32
  }
  func.func @transform_5(%arg0: i32) -> (i32, i32) {
    %c0_i32 = arith.constant 0 : i32
    %c0_i32_0 = arith.constant 0 : i32
    %c0_i32_1 = arith.constant 0 : i32
    return %c0_i32, %c0_i32_0 : i32, i32
  }
  func.func @transform_6(%arg0: i32) -> (i32, i32) {
    %c0_i32 = arith.constant 0 : i32
    %c0_i32_0 = arith.constant 0 : i32
    return %c0_i32, %arg0 : i32, i32
  }
}

</mosaic_0001>

<bundles_post_ra>
// kernel: tpu_custom_call.1
= control target key start
LH: loop header
LB: loop body
LE: loop exit
PB: predicated region body
PF: predicated region fallthrough
CT: control target
= control target key end

     0   :  { %v303_v1 = vmov 0.0   ;;  %vm304_vm0 = vmmov 0   ;;  %vm34_vm1 = vcmask 130048   ;;  %s388_s0 = inlined_call_operand.vmem [shape: f32[8,16], index: 0, kind: input, shape index: {}]   ;;  %s389_s1 = inlined_call_operand.vmem [shape: f32[16,64], index: 1, kind: input, shape index: {}]   ;;  %s390_s2 = inlined_call_operand.vmem [shape: f32[1,64], index: 2, kind: input, shape index: {}]   ;;  %s391_s3 = inlined_call_operand.vmem [shape: f32[64,32], index: 3, kind: input, shape index: {}]   ;;  %s392_s4 = inlined_call_operand.vmem [shape: f32[1,32], index: 4, kind: input, shape index: {}]   ;;  %s393_s5 = inlined_call_operand.vmem [shape: f32[1,32], index: 5, kind: input, shape index: {}]   ;;  %s394_s6 = inlined_call_operand.hbm [shape: f32[1,8], index: 6, kind: output, shape index: {}]  }
   0x1   :  { %v26_v0 = vld [vmem:[%s389_s1 + $0x8] sm:$0xff]  ;;  %252 = vmatprep.subr.mxu0 %v303_v1  ;;  %v25_v2 = vld [vmem:[%s389_s1] sm:$0xff]  ;;  %256 = vmatprep.mubr.msk.f32.mxu0 %vm304_vm0, %v303_v1  ;;  %v116_v3 = vld [vmem:[%s391_s3 + $0x38] sm:$0xff] }
   0x2   :  { %253 = vmatpush3.msra.mxu0 %v26_v0  ;;  %v24_v4 = vld [vmem:[%s388_s0] sm:$0xff]  ;;  %259 = vmatprep.subr.mxu1 %v303_v1  ;;  %v115_v5 = vld [vmem:[%s391_s3 + $0x30] sm:$0xff] }
   0x3   :  { %254 = vmatprep.subr.mxu0 %v303_v1  ;;  %260 = vmatpush3.msra.mxu1 %v116_v3 }
   0x4   :  { %11 = vsyncpa [#allocation3], 0  ;;  %255 = vmatpush3.msra.mxu0 %v25_v2  ;;  %261 = vmatprep.subr.mxu1 %v303_v1  ;;  %v114_v6 = vld [vmem:[%s391_s3 + $0x28] sm:$0xff]  ;;  %v113_v7 = vld [vmem:[%s391_s3 + $0x20] sm:$0xff]  ;;  %vm124_vm2 = vcmask 523264   ;;  %vm207_vm3 = vcmask 261120   ;;  %v212_v25 = vlaneseq }
   0x5   :  { %257 = vmatmul.mubr.msk.f32.vlgmr.msra.gmra.mxu0 %vm34_vm1, %v24_v4  ;;  %262 = vmatpush3.msra.mxu1 %v115_v5  ;;  %v112_v8 = vld [vmem:[%s391_s3 + $0x18] sm:$0xff]  ;;  %v111_v9 = vld [vmem:[%s391_s3 + $0x10] sm:$0xff]  ;;  %v110_v10 = vld [vmem:[%s391_s3 + $0x8] sm:$0xff]  ;;  %vm219_vm4 = vcmask 57344  }
   0x6   :  { %263 = vmatprep.subr.mxu1 %v303_v1  ;;  %275 = vmatprep.mubr.msk.f32.mxu1 %vm304_vm0, %v303_v1  ;;  %v109_v11 = vld [vmem:[%s391_s3] sm:$0xff]  ;;  %v213_v26 = vand.u32 127, %v212_v25  ;;  %v215_v27 = vshrl.u32 %v212_v25, 7 }
   0x7   :  { %264 = vmatpush3.msra.mxu1 %v114_v6  ;;  %v235_v12 = vld [vmem:[%s390_s2] ss:$0 sm:$0xff]  ;;  %s305_s2 = smov [#allocation2]  }
   0x8   :  { %265 = vmatprep.subr.mxu1 %v303_v1  ;;  %v237_v17 = vld [vmem:[%s392_s4] ss:$0 sm:$0xff]  ;;  %v216_v28 = vsub.s32 %v213_v26, %v215_v27  ;;  %s227_s22 = sshll.u32 %s305_s2, 4  ;;  %s228_s22 = int_to_ptr.vmem [resolvable:$true] %s227_s22 }
   0x9   :  { %266 = vmatpush3.msra.mxu1 %v113_v7  ;;  %v239_v21 = vld [vmem:[%s393_s5] ss:$0 sm:$0xff]  ;;  %s281_s4 = scalar_lea.vmem %s228_s22, 16  ;;  %s285_s23 = scalar_lea.vmem %s228_s22, 32 }
   0xa   :  { %267 = vmatprep.subr.mxu1 %v303_v1  ;;  %p282_p0 = scmp.ne.s32.totalorder %s228_s22, %s281_s4  ;;  %p286_p1 = scmp.lt.s32.totalorder %s228_s22, %s228_s22 }
   0xb   :  { %268 = vmatpush3.msra.mxu1 %v112_v8  ;;  %p287_p2 = scmp.lt.s32.totalorder %s285_s23, %s281_s4 }
   0xc   :  { %269 = vmatprep.subr.mxu1 %v303_v1 }
   0xd   :  { %270 = vmatpush3.msra.mxu1 %v111_v9  ;;  %p288_p3 = por %p287_p2, %p286_p1 }
   0xe   :  { %271 = vmatprep.subr.mxu1 %v303_v1 }
   0xf   :  { %272 = vmatpush3.msra.mxu1 %v110_v10  ;;  %p289_p4 = pnand %p288_p3, %p282_p0 }
  0x10   :  { %273 = vmatprep.subr.mxu1 %v303_v1 }
  0x11   :  { %274 = vmatpush3.msra.mxu1 %v109_v11 }
  0xc5   :  { %v104_v13 = vpop.f32.mrf.mxu0 }
  0xc6   :  { %v105_v14 = vadd.f32 %v235_v12, %v104_v13 }
  0xc7   :  { %v258_v15 = vpop.f32.mrf.mxu0 }
  0xc8   :  { %v108_v16 = vmax.f32 %v105_v14, 0.0 }
  0xca   :  { %276 = vmatmul.mubr.msk.f32.vlgmr.msra.gmra.mxu1 %vm124_vm2, %v108_v16 }
 0x18a   :  { %v194_v18 = vpop.f32.mrf.mxu1 }
 0x18b   :  { %v195_v19 = vadd.f32 %v237_v17, %v194_v18 }
 0x18c   :  { %v277_v20 = vpop.f32.mrf.mxu1 }
 0x18d   :  { %v198_v22 = vmax.f32 %v195_v19, 0.0 }
 0x18f   :  { %v206_v23 = vmul.f32 %v239_v21, %v198_v22 }
 0x191   :  { %v208_v24 = vsel %vm207_vm3, %v206_v23, 0.0 }
 0x192   :  { %209 = vadd.xlane.f32.xlu0 %v208_v24 }
 0x21b   :  { %v210_v29 = vpop.xlane.xlu0 %209 }
 0x21c   :  { %v217_v30 = vrot.slane %v210_v29, %v216_v28 }
 0x21e   :  { %220 = vst.msk [vmem:[#allocation2] sm:$0x1] %vm219_vm4, %v217_v30 }
 0x21f   :  { %292 = shalt.err (!%p289_p4)
}
 0x220   :  { %230 = dma.vmem_to_hbm [thread:$0]  %s228_s22, 16, %s394_s6, [#allocation3]  }
 0x221   :  { %301 = dma.done.wait [#allocation3], 16  }
 0x222   :  { %302 = vsyncadd [#allocation3], 4294967280 }
 0x223   :  { %234 = vsyncpa [#allocation3], 1 }

</bundles_post_ra>
